<compile_context>
chip_gen: v5e
topology: v5e:2x2
jax: 0.10.0
libtpu: 0.0.40
codegen_flags: <defaults>
</compile_context>

<pallas_src>
import functools
import math

import jax
import jax.numpy as jnp
from jax import lax
from jax.experimental import pallas as pl
from jax.experimental.pallas import tpu as pltpu


def _encoding_kernel(x_ref, cwm2s_ref, cw_ref, scale_ref, bias_ref, out_ref,
                     acc_atx, acc_asum, *, n_valid, n_padded, tn,
                     blocks_per_split, matmul_dtype):
    """One (batch, split, N-tile) grid step.

    x_ref:      (1, C, TN)   native dtype (f32/bf16) pixel tile (channels on sublanes)
    cwm2s_ref:  (K, C)       matmul dtype  -2 * scale[k] * codewords[k, c]
    cw_ref:     (K, C)       f32           raw codewords (final residual subtraction)
    scale_ref:  (K, 1)       f32           per-code smoothing factor
    bias_ref:   (K, 1)       f32           scale[k] * |codewords[k]|^2
    out_ref:    (1, 1, K, C) f32           encoded features (resident across N tiles)
    acc_atx:    (K, C)       f32 scratch   sum_n A[n,k] * x[n,c]
    acc_asum:   (K, 1)       f32 scratch   sum_n A[n,k]
    """
    n_idx = pl.program_id(2)

    @pl.when(n_idx == 0)
    def _init():
        acc_atx[...] = jnp.zeros_like(acc_atx)
        acc_asum[...] = jnp.zeros_like(acc_asum)

    x = x_ref[0]                                             # (C, TN) native dtype
    xf = x.astype(jnp.float32)                               # upcast for |x|^2 (cancellation)
    x_sq = jnp.sum(xf * xf, axis=0, keepdims=True)           # (1, TN) f32

    xm = x.astype(matmul_dtype)                              # no-op when dtypes match
    # cross[k, n] = sum_c (-2 * scale_k * cw[k, c]) * x[c, n]   (natural MXU layout)
    cross = lax.dot_general(
        cwm2s_ref[...], xm,
        dimension_numbers=(((1,), (0,)), ((), ())),
        preferred_element_type=jnp.float32)                  # (K, TN) f32

    # scaled L2: scale_k * (|x_n|^2 - 2 x_n.cw_k + |cw_k|^2), all in f32
    logits = scale_ref[...] * x_sq + cross + bias_ref[...]   # (K, TN)

    # softmax over the code dimension (sublane axis, K rows) — exact normalizer
    m = jnp.max(logits, axis=0, keepdims=True)               # (1, TN)
    e = jnp.exp(logits - m)                                  # (K, TN)
    denom = jnp.sum(e, axis=0, keepdims=True)                # (1, TN)
    assign = e * (1.0 / denom)                               # (K, TN) f32, unbiased

    if n_valid != n_padded:
        # zero the assignment weights of zero-padded pixel columns before accumulation
        s_idx = pl.program_id(1)
        col = lax.broadcasted_iota(jnp.int32, (1, tn), 1)
        global_col = col + (s_idx * blocks_per_split + n_idx) * tn
        assign = jnp.where(global_col < n_valid, assign, 0.0)

    # accumulate A^T x and sum_n A over this pixel tile (f32 accumulation)
    acc_atx[...] += lax.dot_general(
        assign.astype(matmul_dtype), xm,
        dimension_numbers=(((1,), (1,)), ((), ())),
        preferred_element_type=jnp.float32)                  # (K, C)
    acc_asum[...] += jnp.sum(assign, axis=1, keepdims=True)  # (K, 1)

    @pl.when(n_idx == pl.num_programs(2) - 1)
    def _finalize():
        # enc[k, c] = sum_n A[n,k] * (x[n,c] - cw[k,c])
        out_ref[0, 0] = acc_atx[...] - cw_ref[...] * acc_asum[...]


def _default_vmem_limit_bytes():
    """Generation-aware scoped-VMEM limit (v5e/v6e: 128 MiB physical, v7x: 64 MiB)."""
    cap = None
    try:
        cap = getattr(pltpu.get_tpu_info(), "vmem_capacity_bytes", None)
    except Exception:
        cap = None
    if not cap:
        cap = 128 << 20
    return int(min(max(cap // 2, 32 << 20), 96 << 20))


def _pick_tile_n(n_padded, c, itemsize, budget_bytes):
    """Largest TN (multiple of 128 dividing n_padded) whose double-buffered (C, TN)
    x tile fits in budget_bytes; capped at 4096 lanes (gains flatten past ~2048)."""
    cap = budget_bytes // max(1, 2 * itemsize * c)
    cap = max(128, (cap // 128) * 128)
    cap = min(cap, 4096)
    tn = max(128, (min(n_padded, cap) // 128) * 128)
    while n_padded % tn:
        tn -= 128
    return tn


@functools.partial(
    jax.jit, static_argnames=("tn", "n_split", "matmul_dtype", "vmem_limit_bytes"))
def encoding_forward(x_nchw, codewords, scale, *, tn=None, n_split=1,
                     matmul_dtype=None, vmem_limit_bytes=None):
    """x_nchw: (B, C, H, W) (f32 or bf16); codewords: (K, C); scale: (K,).
    Returns (B, K, C) f32 encoded features."""
    B, C, H, W = x_nchw.shape
    K = codewords.shape[0]
    N = H * W

    if matmul_dtype is None:
        matmul_dtype = x_nchw.dtype          # bf16 activations -> bf16 MXU operands
    if vmem_limit_bytes is None:
        vmem_limit_bytes = _default_vmem_limit_bytes()

    # Pure reshape (no transpose, no dtype change): channels on sublanes, pixels on lanes.
    x = x_nchw.reshape(B, C, N)
    n_padded = -(-N // 128) * 128
    if n_padded != N:
        x = jnp.pad(x, ((0, 0), (0, 0), (0, n_padded - N)))

    itemsize = jnp.dtype(x.dtype).itemsize
    if tn is None:
        tn = _pick_tile_n(n_padded, C, itemsize, vmem_limit_bytes // 4)
    assert n_padded % tn == 0, (n_padded, tn)
    blocks = n_padded // tn
    n_split = max(1, math.gcd(int(n_split), blocks))
    blocks_per_split = blocks // n_split

    # Hoisted per-code constants (grid-invariant residents).
    cw = codewords.astype(jnp.float32)                          # (K, C)
    sc = scale.astype(jnp.float32).reshape(K, 1)                # (K, 1)
    cwm2s = ((-2.0) * sc * cw).astype(matmul_dtype)             # (K, C)
    bias = sc * jnp.sum(cw * cw, axis=1, keepdims=True)         # (K, 1)

    kernel = functools.partial(
        _encoding_kernel, n_valid=N, n_padded=n_padded, tn=tn,
        blocks_per_split=blocks_per_split, matmul_dtype=matmul_dtype)

    out = pl.pallas_call(
        kernel,
        out_shape=jax.ShapeDtypeStruct((B, n_split, K, C), jnp.float32),
        grid_spec=pltpu.PrefetchScalarGridSpec(
            num_scalar_prefetch=0,
            grid=(B, n_split, blocks_per_split),
            in_specs=[
                pl.BlockSpec((1, C, tn),
                             lambda b, s, n: (b, 0, s * blocks_per_split + n)),  # x tile
                pl.BlockSpec((K, C), lambda b, s, n: (0, 0)),   # -2*scale*cw (resident)
                pl.BlockSpec((K, C), lambda b, s, n: (0, 0)),   # codewords   (resident)
                pl.BlockSpec((K, 1), lambda b, s, n: (0, 0)),   # scale       (resident)
                pl.BlockSpec((K, 1), lambda b, s, n: (0, 0)),   # scale*|cw|^2
            ],
            out_specs=pl.BlockSpec((1, 1, K, C), lambda b, s, n: (b, s, 0, 0)),
            scratch_shapes=[
                pltpu.VMEM((K, C), jnp.float32),    # acc_atx
                pltpu.VMEM((K, 1), jnp.float32),    # acc_asum
            ],
        ),
        compiler_params=pltpu.CompilerParams(
            dimension_semantics=("parallel", "parallel", "arbitrary"),
            vmem_limit_bytes=vmem_limit_bytes,
        ),
    )(x, cwm2s, cw, sc, bias)

    # Sum over the n_split partial reductions (size-1 axis when n_split == 1).
    return jnp.sum(out, axis=1)


def encoding_reference(x_nchw, codewords, scale):
    """Pure-JAX reference mirroring the PyTorch module exactly."""
    B, C, H, W = x_nchw.shape
    x = jnp.transpose(x_nchw.reshape(B, C, H * W).astype(jnp.float32), (0, 2, 1))
    diff = x[:, :, None, :] - codewords[None, None, :, :]            # (B, N, K, C)
    scaled_l2 = scale[None, None, :] * jnp.sum(diff * diff, axis=3)  # (B, N, K)
    assign = jax.nn.softmax(scaled_l2, axis=2)                       # (B, N, K)
    enc = jnp.sum(assign[..., None] * diff, axis=1)                  # (B, K, C)
    return enc


if __name__ == "__main__":
    # Small shapes consistent with the module: B=2, channels=4, H=W=16, num_codes=8
    B, C, H, W = 2, 4, 16, 16
    K = 8

    key = jax.random.PRNGKey(0)
    kx, kcw, ksc = jax.random.split(key, 3)

    x = jax.random.normal(kx, (B, C, H, W), dtype=jnp.float32)

    # Deterministic parameter init mirroring the PyTorch __init__ distributions.
    std = 1.0 / (K * C) ** 0.5
    codewords = jax.random.uniform(kcw, (K, C), dtype=jnp.float32,
                                   minval=-std, maxval=std)
    scale = jax.random.uniform(ksc, (K,), dtype=jnp.float32,
                               minval=-1.0, maxval=0.0)

    ref = encoding_reference(x, codewords, scale)

    # 1) f32 path; tn=128 forces two N tiles so the accumulator path is exercised.
    out = jax.block_until_ready(encoding_forward(x, codewords, scale, tn=128))
    assert out.shape == (B, K, C), out.shape
    assert jnp.allclose(out, ref, rtol=2e-3, atol=2e-3), \
        float(jnp.max(jnp.abs(out - ref)))

    # 2) N sweep split into two "parallel" partial reductions (feeds both v7x TCs).
    out_split = jax.block_until_ready(
        encoding_forward(x, codewords, scale, tn=128, n_split=2))
    assert jnp.allclose(out_split, ref, rtol=2e-3, atol=2e-3), \
        float(jnp.max(jnp.abs(out_split - ref)))

    # 3) H*W not a multiple of 128 -> zero-padded pixels, lane-masked accumulation.
    x_odd = jax.random.normal(kx, (B, C, 15, 15), dtype=jnp.float32)
    ref_odd = encoding_reference(x_odd, codewords, scale)
    out_odd = jax.block_until_ready(encoding_forward(x_odd, codewords, scale))
    assert jnp.allclose(out_odd, ref_odd, rtol=2e-3, atol=2e-3), \
        float(jnp.max(jnp.abs(out_odd - ref_odd)))

    # 4) bf16 activations ingested natively (halves the HBM read of x); compared
    #    against the f32 reference evaluated on the same bf16-rounded input. Loose
    #    tolerance accounts for bf16 MXU operands (assign / -2*scale*cw).
    x_bf16 = x.astype(jnp.bfloat16)
    ref_bf16 = encoding_reference(x_bf16, codewords, scale)
    out_bf16 = jax.block_until_ready(encoding_forward(x_bf16, codewords, scale))
    assert jnp.allclose(out_bf16, ref_bf16, rtol=1e-1, atol=1e-1), \
        float(jnp.max(jnp.abs(out_bf16 - ref_bf16)))

    print("KERNEL_OK")
</pallas_src>

<mosaic_0001>
module attributes {stable_mosaic.version = 11 : i64} {
  func.func @_encoding_kernel(%arg0: i32, %arg1: i32, %arg2: i32, %arg3: memref<1x4x128xf32, #tpu.memory_space<vmem>>, %arg4: memref<8x4xf32, #tpu.memory_space<vmem>>, %arg5: memref<8x4xf32, #tpu.memory_space<vmem>>, %arg6: memref<8x1xf32, #tpu.memory_space<vmem>>, %arg7: memref<8x1xf32, #tpu.memory_space<vmem>>, %arg8: memref<1x1x8x4xf32, #tpu.memory_space<vmem>>, %arg9: memref<8x4xf32, #tpu.memory_space<vmem>>, %arg10: memref<8x1xf32, #tpu.memory_space<vmem>>) attributes {dimension_semantics = [#tpu.dimension_semantics<parallel>, #tpu.dimension_semantics<parallel>, #tpu.dimension_semantics<arbitrary>], iteration_bounds = array<i64: 2, 1, 2>, scalar_prefetch = 0 : i64, scratch_operands = 2 : i64, tpu.core_type = #tpu.core_type<tc>, window_params = [{transform_indices = @transform_0, window_bounds = array<i64: 1, 4, 128>}, {pipeline_mode = #tpu.pipeline_mode<synchronous>, transform_indices = @transform_1, window_bounds = array<i64: 8, 4>}, {pipeline_mode = #tpu.pipeline_mode<synchronous>, transform_indices = @transform_2, window_bounds = array<i64: 8, 4>}, {pipeline_mode = #tpu.pipeline_mode<synchronous>, transform_indices = @transform_3, window_bounds = array<i64: 8, 1>}, {pipeline_mode = #tpu.pipeline_mode<synchronous>, transform_indices = @transform_4, window_bounds = array<i64: 8, 1>}, {transform_indices = @transform_5, window_bounds = array<i64: 1, 1, 8, 4>}]} {
    %c0_i32 = arith.constant 0 : i32
    %0 = arith.cmpi eq, %arg2, %c0_i32 : i32
    %1 = arith.extui %0 : i1 to i32
    %c0_i32_0 = arith.constant 0 : i32
    %2 = arith.cmpi ne, %1, %c0_i32_0 : i32
    scf.if %2 {
      %cst_24 = arith.constant 0.000000e+00 : f32
      %41 = vector.broadcast %cst_24 : f32 to vector<8x4xf32>
      %c0_25 = arith.constant 0 : index
      %c0_26 = arith.constant 0 : index
      %42 = vector.load %arg9[%c0_25, %c0_26] : memref<8x4xf32, #tpu.memory_space<vmem>>, vector<8x4xf32>
      tpu.vector_store %arg9[%c0_25, %c0_26], %41 {strides = array<i32>} : memref<8x4xf32, #tpu.memory_space<vmem>>, vector<8x4xf32>,
      %cst_27 = arith.constant 0.000000e+00 : f32
      %43 = vector.broadcast %cst_27 : f32 to vector<8x1xf32>
      %c0_28 = arith.constant 0 : index
      %c0_29 = arith.constant 0 : index
      %44 = vector.load %arg10[%c0_28, %c0_29] : memref<8x1xf32, #tpu.memory_space<vmem>>, vector<8x1xf32>
      tpu.vector_store %arg10[%c0_28, %c0_29], %43 {strides = array<i32>} : memref<8x1xf32, #tpu.memory_space<vmem>>, vector<8x1xf32>,
    } else {
    }
    %c0 = arith.constant 0 : index
    %c0_1 = arith.constant 0 : index
    %c0_2 = arith.constant 0 : index
    %3 = vector.load %arg3[%c0, %c0_1, %c0_2] : memref<1x4x128xf32, #tpu.memory_space<vmem>>, vector<1x4x128xf32>
    %4 = vector.shape_cast %3 : vector<1x4x128xf32> to vector<4x128xf32>
    %5 = arith.mulf %4, %4 : vector<4x128xf32>
    %cst = arith.constant dense<0.000000e+00> : vector<128xf32>
    %6 = vector.multi_reduction <add>, %5, %cst [0] : vector<4x128xf32> to vector<128xf32>
    %7 = vector.shape_cast %6 : vector<128xf32> to vector<1x128xf32>
    %c0_3 = arith.constant 0 : index
    %c0_4 = arith.constant 0 : index
    %8 = vector.load %arg4[%c0_3, %c0_4] : memref<8x4xf32, #tpu.memory_space<vmem>>, vector<8x4xf32>
    %cst_5 = arith.constant dense<0.000000e+00> : vector<8x128xf32>
    %9 = tpu.matmul %8, %4, %cst_5 {dimension_numbers = #tpu.dot_dimension_numbers<[1], [0], [0], [1], [0, 0, 1, 1], [], []>} : vector<8x4xf32>, vector<4x128xf32>, vector<8x128xf32> -> vector<8x128xf32>
    %c0_6 = arith.constant 0 : index
    %c0_7 = arith.constant 0 : index
    %10 = vector.load %arg6[%c0_6, %c0_7] : memref<8x1xf32, #tpu.memory_space<vmem>>, vector<8x1xf32>
    %11 = vector.broadcast %10 : vector<8x1xf32> to vector<8x128xf32>
    %12 = vector.broadcast %7 : vector<1x128xf32> to vector<8x128xf32>
    %13 = arith.mulf %11, %12 : vector<8x128xf32>
    %14 = arith.addf %13, %9 : vector<8x128xf32>
    %c0_8 = arith.constant 0 : index
    %c0_9 = arith.constant 0 : index
    %15 = vector.load %arg7[%c0_8, %c0_9] : memref<8x1xf32, #tpu.memory_space<vmem>>, vector<8x1xf32>
    %16 = vector.broadcast %15 : vector<8x1xf32> to vector<8x128xf32>
    %17 = arith.addf %14, %16 : vector<8x128xf32>
    %cst_10 = arith.constant dense<0xFF800000> : vector<128xf32>
    %18 = vector.multi_reduction <maximumf>, %17, %cst_10 [0] : vector<8x128xf32> to vector<128xf32>
    %19 = vector.shape_cast %18 : vector<128xf32> to vector<1x128xf32>
    %20 = vector.broadcast %19 : vector<1x128xf32> to vector<8x128xf32>
    %21 = arith.subf %17, %20 : vector<8x128xf32>
    %22 = math.exp %21 : vector<8x128xf32>
    %cst_11 = arith.constant dense<0.000000e+00> : vector<128xf32>
    %23 = vector.multi_reduction <add>, %22, %cst_11 [0] : vector<8x128xf32> to vector<128xf32>
    %24 = vector.shape_cast %23 : vector<128xf32> to vector<1x128xf32>
    %cst_12 = arith.constant 1.000000e+00 : f32
    %25 = vector.broadcast %cst_12 : f32 to vector<1x128xf32>
    %26 = arith.divf %25, %24 : vector<1x128xf32>
    %27 = vector.broadcast %26 : vector<1x128xf32> to vector<8x128xf32>
    %28 = arith.mulf %22, %27 : vector<8x128xf32>
    %c0_13 = arith.constant 0 : index
    %c0_14 = arith.constant 0 : index
    %29 = vector.load %arg9[%c0_13, %c0_14] : memref<8x4xf32, #tpu.memory_space<vmem>>, vector<8x4xf32>
    %cst_15 = arith.constant dense<0.000000e+00> : vector<8x4xf32>
    %30 = tpu.matmul %28, %4, %cst_15 {dimension_numbers = #tpu.dot_dimension_numbers<[1], [1], [0], [0], [0, 0, 1, 0], [], []>} : vector<8x128xf32>, vector<4x128xf32>, vector<8x4xf32> -> vector<8x4xf32>
    %31 = arith.addf %29, %30 : vector<8x4xf32>
    %c0_16 = arith.constant 0 : index
    %c0_17 = arith.constant 0 : index
    %32 = vector.load %arg9[%c0_16, %c0_17] : memref<8x4xf32, #tpu.memory_space<vmem>>, vector<8x4xf32>
    tpu.vector_store %arg9[%c0_16, %c0_17], %31 {strides = array<i32>} : memref<8x4xf32, #tpu.memory_space<vmem>>, vector<8x4xf32>,
    %c0_18 = arith.constant 0 : index
    %c0_19 = arith.constant 0 : index
    %33 = vector.load %arg10[%c0_18, %c0_19] : memref<8x1xf32, #tpu.memory_space<vmem>>, vector<8x1xf32>
    %cst_20 = arith.constant dense<0.000000e+00> : vector<8xf32>
    %34 = vector.multi_reduction <add>, %28, %cst_20 [1] : vector<8x128xf32> to vector<8xf32>
    %35 = vector.shape_cast %34 : vector<8xf32> to vector<8x1xf32>
    %36 = arith.addf %33, %35 : vector<8x1xf32>
    %c0_21 = arith.constant 0 : index
    %c0_22 = arith.constant 0 : index
    %37 = vector.load %arg10[%c0_21, %c0_22] : memref<8x1xf32, #tpu.memory_space<vmem>>, vector<8x1xf32>
    tpu.vector_store %arg10[%c0_21, %c0_22], %36 {strides = array<i32>} : memref<8x1xf32, #tpu.memory_space<vmem>>, vector<8x1xf32>,
    %c1_i32 = arith.constant 1 : i32
    %38 = arith.cmpi eq, %arg2, %c1_i32 : i32
    %39 = arith.extui %38 : i1 to i32
    %c0_i32_23 = arith.constant 0 : i32
    %40 = arith.cmpi ne, %39, %c0_i32_23 : i32
    scf.if %40 {
      %c0_24 = arith.constant 0 : index
      %c0_25 = arith.constant 0 : index
      %41 = vector.load %arg9[%c0_24, %c0_25] : memref<8x4xf32, #tpu.memory_space<vmem>>, vector<8x4xf32>
      %c0_26 = arith.constant 0 : index
      %c0_27 = arith.constant 0 : index
      %42 = vector.load %arg5[%c0_26, %c0_27] : memref<8x4xf32, #tpu.memory_space<vmem>>, vector<8x4xf32>
      %c0_28 = arith.constant 0 : index
      %c0_29 = arith.constant 0 : index
      %43 = vector.load %arg10[%c0_28, %c0_29] : memref<8x1xf32, #tpu.memory_space<vmem>>, vector<8x1xf32>
      %44 = vector.broadcast %43 : vector<8x1xf32> to vector<8x4xf32>
      %45 = arith.mulf %42, %44 : vector<8x4xf32>
      %46 = arith.subf %41, %45 : vector<8x4xf32>
      %c0_30 = arith.constant 0 : index
      %c0_31 = arith.constant 0 : index
      %c0_32 = arith.constant 0 : index
      %c0_33 = arith.constant 0 : index
      %47 = vector.load %arg8[%c0_30, %c0_31, %c0_32, %c0_33] : memref<1x1x8x4xf32, #tpu.memory_space<vmem>>, vector<1x1x8x4xf32>
      %48 = vector.shape_cast %47 : vector<1x1x8x4xf32> to vector<8x4xf32>
      %49 = vector.shape_cast %46 : vector<8x4xf32> to vector<1x1x8x4xf32>
      tpu.vector_store %arg8[%c0_30, %c0_31, %c0_32, %c0_33], %49 {strides = array<i32>} : memref<1x1x8x4xf32, #tpu.memory_space<vmem>>, vector<1x1x8x4xf32>,
    } else {
    }
    return
  }
  func.func @transform_0(%arg0: i32, %arg1: i32, %arg2: i32) -> (i32, i32, i32) {
    %c2_i32 = arith.constant 2 : i32
    %0 = arith.muli %arg1, %c2_i32 : i32
    %1 = arith.addi %0, %arg2 : i32
    %c0_i32 = arith.constant 0 : i32
    %c0_i32_0 = arith.constant 0 : i32
    return %arg0, %c0_i32, %1 : i32, i32, i32
  }
  func.func @transform_1(%arg0: i32, %arg1: i32, %arg2: i32) -> (i32, i32) {
    %c0_i32 = arith.constant 0 : i32
    %c0_i32_0 = arith.constant 0 : i32
    %c0_i32_1 = arith.constant 0 : i32
    return %c0_i32, %c0_i32_0 : i32, i32
  }
  func.func @transform_2(%arg0: i32, %arg1: i32, %arg2: i32) -> (i32, i32) {
    %c0_i32 = arith.constant 0 : i32
    %c0_i32_0 = arith.constant 0 : i32
    %c0_i32_1 = arith.constant 0 : i32
    return %c0_i32, %c0_i32_0 : i32, i32
  }
  func.func @transform_3(%arg0: i32, %arg1: i32, %arg2: i32) -> (i32, i32) {
    %c0_i32 = arith.constant 0 : i32
    %c0_i32_0 = arith.constant 0 : i32
    %c0_i32_1 = arith.constant 0 : i32
    return %c0_i32, %c0_i32_0 : i32, i32
  }
  func.func @transform_4(%arg0: i32, %arg1: i32, %arg2: i32) -> (i32, i32) {
    %c0_i32 = arith.constant 0 : i32
    %c0_i32_0 = arith.constant 0 : i32
    %c0_i32_1 = arith.constant 0 : i32
    return %c0_i32, %c0_i32_0 : i32, i32
  }
  func.func @transform_5(%arg0: i32, %arg1: i32, %arg2: i32) -> (i32, i32, i32, i32) {
    %c0_i32 = arith.constant 0 : i32
    %c0_i32_0 = arith.constant 0 : i32
    %c0_i32_1 = arith.constant 0 : i32
    return %arg0, %arg1, %c0_i32, %c0_i32_0 : i32, i32, i32, i32
  }
}

</mosaic_0001>

<bundles_post_ra>
// kernel: mul.13
= control target key start
LH: loop header
LB: loop body
LE: loop exit
PB: predicated region body
PF: predicated region fallthrough
CT: control target
= control target key end

     0   :  { %s34_s0 = inlined_call_operand.vmem [shape: f32[8,1], index: 0, kind: input, shape index: {}]   ;;  %s35_s1 = inlined_call_operand.vmem [shape: f32[8,1], index: 1, kind: input, shape index: {}]   ;;  %s36_s2 = inlined_call_operand.vmem [shape: f32[8,1], index: 2, kind: output, shape index: {}]  }
   0x1   :  { %v3_v0 = vld [vmem:[%s34_s0] sm:$0xff] }
   0x2   :  { %v4_v1 = vld [vmem:[%s35_s1] sm:$0xff] }
   0x3   :  { %v7_v2 = vmul.f32 %v4_v1, %v3_v0 }
   0x5   :  { %9 = vst [vmem:[%s36_s2] sm:$0xff] %v7_v2 }

// kernel: encoding_forward.1
= control target key start
LH: loop header
LB: loop body
LE: loop exit
PB: predicated region body
PF: predicated region fallthrough
CT: control target
= control target key end

     0   :  { %s630_s18 = smov 0   ;;  %s632_s19 = smov 0   ;;  %s705_s0 = inlined_call_operand.vmem [shape: f32[2,4,256], index: 0, kind: input, shape index: {}]   ;;  %s706_s1 = inlined_call_operand.vmem [shape: f32[8,4], index: 1, kind: input, shape index: {}]   ;;  %s707_s2 = inlined_call_operand.vmem [shape: f32[8,4], index: 2, kind: input, shape index: {}]   ;;  %s708_s3 = inlined_call_operand.vmem [shape: f32[8,1], index: 3, kind: input, shape index: {}]   ;;  %s709_s4 = inlined_call_operand.vmem [shape: f32[8,1], index: 4, kind: input, shape index: {}]   ;;  %s710_s5 = inlined_call_operand.vmem [shape: f32[2,1,8,4], index: 5, kind: output, shape index: {}]  }
   0x1   :  { %s634_s20 = smov 0   ;;  %s636_s21 = smov 0  }
   0x2   :  { %s638_s22 = smov 0  }
   0x3 LB: > { %s27_s23 = sadd.s32 1, %s587_s20  ;;  %s34_s24 = sadd.s32 1, %s591_s21  ;;  %s595_s22 = sphi %s638_s22, %s15_s22   ;;  %s591_s21 = sphi %s636_s21, %s714_s21   ;;  %s587_s20 = sphi %s634_s20, %s713_s20   ;;  %s583_s19 = sphi %s632_s19, %s712_s19   ;;  %s579_s18 = sphi %s630_s18, %s711_s18  }
   0x4   : > { %p28_p0 = scmp.ge.s32.totalorder %s27_s23, 2  ;;  %p498_p1 = scmp.ge.s32.totalorder %s595_s22, 1 }
   0x5   : > { %p221_p2 = scmp.lt.s32.totalorder %s595_s22, 5 }
   0x6   : > { %s716_s23 = smov (%p28_p0, %s27_s23), 0  ;;  %s718_s24 = smov (!%p28_p0, %s34_s24), %s591_s21 }
   0x7   : > { %p222_p3 = pnand %p498_p1, %p221_p2  ;;  %p36_p4 = scmp.ge.s32.totalorder %s718_s24, 2 }
   0x8   : > { %p258_p5 = scmp.lt.s32.totalorder (!%p222_p3), %s583_s19, 1  ;;  %p260_p6 = scmp.lt.s32.totalorder (!%p222_p3), %s579_s18, 1 }
   0x9   : > { %s720_s24 = smov (%p36_p4, %s718_s24), 0  ;;  %225 = sbr.rel (%p222_p3) target bundleno = 464 (0x1d0), region = 40 }
   0xa   : > { %p502_p7 = scmp.ne.s32.totalorder (!%p222_p3), %s579_s18, 0 }
   0xe   : > { %s722_s19 = smov (!%p258_p5, %s583_s19), 1 }
   0xf   : > { %s261_s25 = scalar_select %p260_p6, %s579_s18, 1 }
  0x10   : > { %s499_s26 = sshll.u32 %s722_s19, 1  ;;  %s501_s27 = sshll.u32 %s722_s19, 3 }
  0x11   : > { %s263_s28 = sadd.s32 %s499_s26, %s261_s25  ;;  %s667_s6 = scalar_lea.vmem %s710_s5, %s501_s27 }
  0x12   : > { %s500_s7 = sshll.u32 %s263_s28, 2  ;;  %278 = sbr.rel (%p502_p7) target bundleno = 26 (0x1a), region = 44 }
  0x13   : > { %s265_s10 = scalar_lea.vmem %s705_s0, %s500_s7 }
  0x17   : > { %vm279_vm0 = vcmask 31744   ;;  %vm281_vm1 = vcmask 7168   ;;  %v597_v0 = vmov 0.0  }
  0x18   : > { %280 = vst.msk [vmem:[#allocation2] sm:$0xff] %vm279_vm0, %v597_v0 }
  0x19   : > { %282 = vst.msk [vmem:[#allocation3] sm:$0xff] %vm281_vm1, %v597_v0 }
  0x1a PF: > { %v283_v1 = vld [vmem:[%s265_s10] sm:$0xf]  ;;  %vm285_vm2 = vcmask 1043456   ;;  %v598_v4 = vmov 0   ;;  %vm294_vm3 = vcmask 31744   ;;  %vm394_vm8 = vcmask 7168  }
  0x1b   : > { %v321_v2 = vld [vmem:[%s708_s3] sm:$0xff]  ;;  %551 = vset.pattern.permute.xlu0 %v598_v4  ;;  %v284_v5 = vmul.f32 %v283_v1, %v283_v1  ;;  %503 = vmatpush.msk.msra.mxu0 %vm285_vm2, %v283_v1  ;;  %p505_p8 = scmp.ne.s32.totalorder %s579_s18, 1 }
  0x1c   : > { %v293_v3 = vld [vmem:[%s706_s1] sm:$0xff]  ;;  %324 = vperm.xlu0 %551, %v321_v2   ;;  %383 = vmatpush.xpose.msra.mxu1 %v283_v1 }
  0x1d   : > { %504 = vmatmul.msk.f32.vlgmr.msra.gmra.mxu0 %vm294_vm3, %v293_v3  ;;  %v286_v6 = vsel %vm285_vm2, %v284_v5, 0.0  ;;  %v329_v7 = vld [vmem:[%s709_s4] sm:$0xff] }
  0x1e   : > { %v287_v8 = vrot.slane %v286_v6, 4 }
  0x1f   : > { %v367_v49 = vld [vmem:[#allocation2] sm:$0xff] }
  0x20   : > { %v288_v9 = vadd.f32 %v287_v8, %v286_v6  ;;  %v390_v46 = vld [vmem:[#allocation3] sm:$0xff] }
  0x22   : > { %v289_v10 = vrot.slane %v288_v9, 2 }
  0x24   : > { %332 = vperm.xlu0 %551, %v329_v7   ;;  %v290_v11 = vadd.f32 %v289_v10, %v288_v9 }
  0x26   : > { %v291_v12 = vrot.slane %v290_v11, 1 }
  0x28   : > { %v292_v14 = vadd.f32 %v291_v12, %v290_v11 }
  0x8e   : > { %v325_v13 = vpop.permute.xlu0 %324 }
  0x8f   : > { %v327_v15 = vmul.f32 %v325_v13, %v292_v14 }
  0x96   : > { %v333_v18 = vpop.permute.xlu0 %332 }
  0x9a   : > { %v318_v16 = vpop.f32.mrf.mxu0 }
  0x9b   : > { %v328_v17 = vadd.f32 %v327_v15, %v318_v16 }
  0x9d   : > { %v335_v19 = vadd.f32 %v333_v18, %v328_v17 }
  0x9f   : > { %v336_v20 = vrot.slane %v335_v19, 4 }
  0xa1   : > { %v337_v21 = vmax.f32 %v335_v19, %v336_v20 }
  0xa3   : > { %v338_v22 = vrot.slane %v337_v21, 2 }
  0xa5   : > { %v339_v23 = vmax.f32 %v337_v21, %v338_v22 }
  0xa7   : > { %v340_v24 = vrot.slane %v339_v23, 1 }
  0xa9   : > { %v341_v25 = vmax.f32 %v339_v23, %v340_v24 }
  0xab   : > { %v342_v26 = vsub.f32 %v335_v19, %v341_v25 }
  0xad   : > { %v343_v27 = vmul.f32 1.442695, %v342_v26 }
  0xaf   : > { %552 = vpow2.f32 %v343_v27 }
  0xb5   : > { %v553_v28 = vpop.eup %552 }
  0xb6   : > { %v345_v29 = vrot.slane %v553_v28, 4 }
  0xb8   : > { %v346_v30 = vadd.f32 %v553_v28, %v345_v29 }
  0xba   : > { %v347_v31 = vrot.slane %v346_v30, 2 }
  0xbc   : > { %v348_v32 = vadd.f32 %v347_v31, %v346_v30 }
  0xbe   : > { %v349_v33 = vrot.slane %v348_v32, 1 }
  0xc0   : > { %v350_v34 = vadd.f32 %v349_v33, %v348_v32 }
  0xc2   : > { %554 = vrcp.f32 %v350_v34  ;;  %v362_v38 = vand.u32 2147483648, %v350_v34  ;;  %v360_v40 = vand.u32 2147483647, %v350_v34  ;;  %vm356_vm5 = vweird.f32 %v350_v34 }
  0xc4   : > { %v363_v42 = vor.u32 1.1754944e-38, %v362_v38  ;;  %vm361_vm7 = vcmp.eq.f32.partialorder %v360_v40, 8.507059e+37 }
  0xc8   : > { %v555_v35 = vpop.eup %554 }
  0xc9   : > { %v352_v36 = vmul.f32 %v555_v35, %v350_v34  ;;  %vm357_vm4 = vweird.f32 %v555_v35 }
  0xca   : > { %vm358_vm6 = vmor %vm356_vm5, %vm357_vm4 }
  0xcb   : > { %v353_v37 = vsub.f32 1.0, %v352_v36 }
  0xcd   : > { %v354_v39 = vmul.f32 %v555_v35, %v353_v37 }
  0xcf   : > { %v355_v41 = vadd.f32 %v555_v35, %v354_v39 }
  0xd1   : > { %v359_v43 = vsel %vm358_vm6, %v555_v35, %v355_v41 }
  0xd2   : > { %v364_v44 = vsel %vm361_vm7, %v363_v42, %v359_v43 }
  0xd3   : > { %v366_v45 = vmul.f32 %v553_v28, %v364_v44 }
  0xd5   : > { %391 = vadd.xlane.f32.xlu1 %v366_v45  ;;  %384 = vmatmul.f32.vlgmr.msra.gmra.mxu1 %v366_v45 }
 0x148   : > { %v392_v47 = vpop.xlane.xlu1 %391 }
 0x149   : > { %v393_v48 = vadd.f32 %v392_v47, %v390_v46 }
 0x14b   : > { %395 = vst.msk [vmem:[#allocation3] sm:$0xff] %vm394_vm8, %v393_v48 }
 0x151   : > { %399 = sbr.rel (%p505_p8) target bundleno = 464 (0x1d0), region = 48 }
 0x152   : > { %v385_v50 = vpop.f32.mrf.mxu1 }
 0x153   : > { %v388_v51 = vadd.f32 %v385_v50, %v367_v49 }
 0x155   : > { %389 = vst.msk [vmem:[#allocation2] sm:$0xff] %vm294_vm3, %v388_v51 }
 0x156   : > { %v402_v52 = vld [vmem:[#allocation3] sm:$0xff]  ;;  %v599_v53 = vmov 0   ;;  %v401_v54 = vld [vmem:[%s707_s2] sm:$0xff] }
 0x157   : > { %556 = vset.pattern.permute.xlu0 %v599_v53 }
 0x158   : > { %405 = vperm.xlu0 %556, %v402_v52  }
 0x15c   : > { %v400_v56 = vld [vmem:[#allocation2] sm:$0xff] }
 0x1ca   : > { %v406_v55 = vpop.permute.xlu0 %405 }
 0x1cb   : > { %v408_v57 = vmul.f32 %v406_v55, %v401_v54 }
 0x1cd   : > { %v409_v58 = vsub.f32 %v400_v56, %v408_v57 }
 0x1cf   : > { %410 = vst.msk [vmem:[%s667_s6] sm:$0xff] %vm294_vm3, %v409_v58 }
 0x1d0 PF: > { %s15_s22 = sadd.s32 1, %s595_s22   ;;  %s711_s18 = smov %s587_s20 }
 0x1d1   : > { %p12_p9 = scmp.ge.s32.totalorder %s15_s22, 6   ;;  %s712_s19 = smov %s591_s21 }
 0x1d2   : > { %s713_s20 = smov %s716_s23  ;;  %s714_s21 = smov %s720_s24 }
 0x1d3   :  { %14 = sbr.rel (!%p12_p9) target bundleno = 3 (0x3), region = 78 }

</bundles_post_ra>
